<compile_context>
chip_gen: v6e
topology: v6e:2x2x1
jax: 0.10.0
libtpu: 0.0.40
codegen_flags: <defaults>
</compile_context>

<pallas_src>
import numpy as np

import jax
import jax.numpy as jnp
from jax.experimental import pallas as pl
from jax.experimental.pallas import tpu as pltpu


def _round_up(x, m):
    return (x + m - 1) // m * m


def _make_kernel(precision):
    def kernel(flags_ref, w_ref, s_ref, base_ref, o_ref):
        jt = pl.program_id(0)  # T-tile index (outer axis)

        @pl.when(flags_ref[jt] != 0)
        def _():
            acc = jnp.dot(
                w_ref[...], s_ref[...],
                preferred_element_type=jnp.float32,
                precision=precision,
            )
            # base add is VPU work, hidden under the MXU / store slots.
            o_ref[...] = (acc + base_ref[...]).astype(o_ref.dtype)

        @pl.when(flags_ref[jt] == 0)
        def _():
            # No scattered column lands in this T tile: pure ones fill.
            o_ref[...] = jnp.ones(o_ref.shape, o_ref.dtype)

    return kernel


def w_identity_compose(w, indices, total_size, *, out_dtype=jnp.float32,
                       tile_b=512, tile_t=1024, interpret=False):
    """JAX/Pallas equivalent of WIdentityCompose(total_size, indices)(w)."""
    idx = np.asarray(indices, dtype=np.int64).reshape(-1)
    k = int(idx.shape[0])
    assert w.shape[-1] == k, "last dim of w must equal len(indices)"
    assert k == 0 or (idx.min() >= 0 and idx.max() < total_size)

    lead = w.shape[:-1]
    b = 1
    for d in lead:
        b *= int(d)

    if k == 0 or b == 0:
        return jnp.ones((*lead, total_size), out_dtype)

    compute_dtype = w.dtype
    itemsize = int(jnp.dtype(compute_dtype).itemsize)

    # ---- Tile geometry -------------------------------------------------------
    tile_b = int(tile_b)
    tile_t = int(tile_t)
    # Block == full dim when the array fits in one tile (always legal, no
    # masking); otherwise 8/128-aligned tiles with Pallas-masked edge blocks.
    tile_b = b if b <= tile_b else _round_up(tile_b, 8)
    tile_t = total_size if total_size <= tile_t else _round_up(tile_t, 128)

    def vmem_need(tb, tt):
        out_t = _round_up(tb, 8) * _round_up(tt, 128) * 4
        s_t = _round_up(k, 16) * _round_up(tt, 128) * itemsize
        w_t = _round_up(tb, 8) * _round_up(k, 128) * itemsize
        base_t = 8 * _round_up(tt, 128) * 4
        return 2 * (out_t + s_t + w_t + base_t)  # double-buffered

    budget = 28 << 20  # conservative: fits v7x (64 MiB) / v5e scoped limits
    for _ in range(16):
        if vmem_need(tile_b, tile_t) <= budget:
            break
        if tile_t > 128:
            tile_t = max(128, _round_up(tile_t // 2, 128))
        elif tile_b > 8:
            tile_b = max(8, _round_up(tile_b // 2, 8))
        else:
            break

    n_t = pl.cdiv(total_size, tile_t)
    n_b = pl.cdiv(b, tile_b)
    t_pad = n_t * tile_t  # S/base are host-padded so their blocks are full

    # ---- Host-built static constants ----------------------------------------
    s_np = np.zeros((k, t_pad), dtype=np.float32)
    # Last-write-wins for duplicate indices (matches PyTorch scatter).
    _, rev_first = np.unique(idx[::-1], return_index=True)
    winners = (k - 1) - rev_first
    s_np[winners, idx[winners]] = 1.0

    base_np = np.ones((1, t_pad), dtype=np.float32)
    base_np[0, idx] = 0.0

    flags_np = np.zeros((n_t,), dtype=np.int32)
    flags_np[idx // tile_t] = 1

    s_mat = jnp.asarray(s_np, dtype=compute_dtype)   # 0/1 exact in any float
    base = jnp.asarray(base_np, dtype=jnp.float32)
    flags = jnp.asarray(flags_np)

    w2d = w.reshape(b, k)  # no concat/pad copies of w

    precision = (jax.lax.Precision.HIGHEST
                 if compute_dtype == jnp.float32 else None)
    kernel = _make_kernel(precision)

    # ---- Pallas call ---------------------------------------------------------
    # Grid: (T tiles, B tiles) -> B innermost, so S's block index changes only
    # on the outer axis and the DMA revisit-skip keeps S streamed once total.
    grid_spec = pltpu.PrefetchScalarGridSpec(
        num_scalar_prefetch=1,
        grid=(n_t, n_b),
        in_specs=[
            pl.BlockSpec((tile_b, k), lambda jt, ib, flags: (ib, 0)),
            pl.BlockSpec((k, tile_t), lambda jt, ib, flags: (0, jt)),
            pl.BlockSpec((1, tile_t), lambda jt, ib, flags: (0, jt)),
        ],
        out_specs=pl.BlockSpec((tile_b, tile_t),
                               lambda jt, ib, flags: (ib, jt)),
    )

    vmem_limit = int(min(100 << 20,
                         max(32 << 20, vmem_need(tile_b, tile_t) + (8 << 20))))

    out = pl.pallas_call(
        kernel,
        out_shape=jax.ShapeDtypeStruct((b, total_size), out_dtype),
        grid_spec=grid_spec,
        compiler_params=pltpu.CompilerParams(
            dimension_semantics=("parallel", "parallel"),
            vmem_limit_bytes=vmem_limit),
        interpret=interpret,
    )(flags, w2d, s_mat, base)

    return out.reshape(*lead, total_size)


def _reference(w, indices, total_size):
    ref = jnp.ones((*w.shape[:-1], total_size), jnp.float32)
    return ref.at[..., jnp.asarray(indices)].set(w.astype(jnp.float32))


if __name__ == "__main__":
    key = jax.random.PRNGKey(0)

    # Test 1: small, single-tile case (total_size < 128).
    total_size = 16
    indices = [1, 3, 4, 7, 8, 10, 13, 15]
    w = jax.random.normal(key, (2, 4, len(indices)), dtype=jnp.float32)

    out = w_identity_compose(w, indices, total_size)
    out = jax.block_until_ready(out)

    ref = _reference(w, indices, total_size)
    assert out.shape == (2, 4, total_size)
    assert out.dtype == jnp.float32
    assert jnp.allclose(out, ref, atol=1e-6, rtol=0), "mismatch vs reference"

    # Test 2: multi-T-tile case exercising the ones-fill skip path
    # (indices only touch the first of three 512-wide tiles).
    total_size2 = 1536
    indices2 = [0, 5, 17, 64, 100, 200, 333, 511]
    w2 = jax.random.normal(jax.random.PRNGKey(1), (2, 4, len(indices2)),
                           dtype=jnp.float32)
    out2 = w_identity_compose(w2, indices2, total_size2, tile_t=512)
    out2 = jax.block_until_ready(out2)
    ref2 = _reference(w2, indices2, total_size2)
    assert out2.shape == (2, 4, total_size2)
    assert jnp.allclose(out2, ref2, atol=1e-6, rtol=0), "mismatch vs reference"

    print("KERNEL_OK")
</pallas_src>

<mosaic_0001>
module attributes {stable_mosaic.version = 11 : i64} {
  func.func @kernel(%arg0: i32, %arg1: i32, %arg2: memref<1xi32, #tpu.memory_space<smem>>, %arg3: memref<8x8xf32, #tpu.memory_space<vmem>>, %arg4: memref<8x16xf32, #tpu.memory_space<vmem>>, %arg5: memref<1x16xf32, #tpu.memory_space<vmem>>, %arg6: memref<8x16xf32, #tpu.memory_space<vmem>>) attributes {dimension_semantics = [#tpu.dimension_semantics<parallel>, #tpu.dimension_semantics<parallel>], iteration_bounds = array<i64: 1, 1>, scalar_prefetch = 1 : i64, scratch_operands = 0 : i64, tpu.core_type = #tpu.core_type<tc>, window_params = [{transform_indices = @transform_0, window_bounds = array<i64: 8, 8>}, {transform_indices = @transform_1, window_bounds = array<i64: 8, 16>}, {transform_indices = @transform_2, window_bounds = array<i64: 1, 16>}, {transform_indices = @transform_3, window_bounds = array<i64: 8, 16>}]} {
    %0 = arith.index_cast %arg0 : i32 to index
    %1 = memref.load %arg2[%0] : memref<1xi32, #tpu.memory_space<smem>>
    %c0_i32 = arith.constant 0 : i32
    %2 = arith.cmpi ne, %1, %c0_i32 : i32
    %3 = arith.extui %2 : i1 to i32
    %c0_i32_0 = arith.constant 0 : i32
    %4 = arith.cmpi ne, %3, %c0_i32_0 : i32
    scf.if %4 {
      %c0 = arith.constant 0 : index
      %c0_3 = arith.constant 0 : index
      %10 = vector.load %arg3[%c0, %c0_3] : memref<8x8xf32, #tpu.memory_space<vmem>>, vector<8x8xf32>
      %c0_4 = arith.constant 0 : index
      %c0_5 = arith.constant 0 : index
      %11 = vector.load %arg4[%c0_4, %c0_5] : memref<8x16xf32, #tpu.memory_space<vmem>>, vector<8x16xf32>
      %cst = arith.constant dense<0.000000e+00> : vector<8x16xf32>
      %12 = tpu.matmul %10, %11, %cst {dimension_numbers = #tpu.dot_dimension_numbers<[1], [0], [0], [1], [0, 0, 1, 1], [], []>, precision = #tpu.contract_precision<fp32>} : vector<8x8xf32>, vector<8x16xf32>, vector<8x16xf32> -> vector<8x16xf32>
      %c0_6 = arith.constant 0 : index
      %c0_7 = arith.constant 0 : index
      %13 = vector.load %arg5[%c0_6, %c0_7] : memref<1x16xf32, #tpu.memory_space<vmem>>, vector<1x16xf32>
      %14 = vector.broadcast %13 : vector<1x16xf32> to vector<8x16xf32>
      %15 = arith.addf %12, %14 : vector<8x16xf32>
      %c0_8 = arith.constant 0 : index
      %c0_9 = arith.constant 0 : index
      %16 = vector.load %arg6[%c0_8, %c0_9] : memref<8x16xf32, #tpu.memory_space<vmem>>, vector<8x16xf32>
      tpu.vector_store %arg6[%c0_8, %c0_9], %15 {strides = array<i32>} : memref<8x16xf32, #tpu.memory_space<vmem>>, vector<8x16xf32>,
    } else {
    }
    %5 = arith.index_cast %arg0 : i32 to index
    %6 = memref.load %arg2[%5] : memref<1xi32, #tpu.memory_space<smem>>
    %c0_i32_1 = arith.constant 0 : i32
    %7 = arith.cmpi eq, %6, %c0_i32_1 : i32
    %8 = arith.extui %7 : i1 to i32
    %c0_i32_2 = arith.constant 0 : i32
    %9 = arith.cmpi ne, %8, %c0_i32_2 : i32
    scf.if %9 {
      %cst = arith.constant 1.000000e+00 : f32
      %10 = vector.broadcast %cst : f32 to vector<8x16xf32>
      %c0 = arith.constant 0 : index
      %c0_3 = arith.constant 0 : index
      %11 = vector.load %arg6[%c0, %c0_3] : memref<8x16xf32, #tpu.memory_space<vmem>>, vector<8x16xf32>
      tpu.vector_store %arg6[%c0, %c0_3], %10 {strides = array<i32>} : memref<8x16xf32, #tpu.memory_space<vmem>>, vector<8x16xf32>,
    } else {
    }
    return
  }
  func.func @transform_0(%arg0: i32, %arg1: i32, %arg2: memref<1xi32, #tpu.memory_space<smem>>) -> (i32, i32) {
    %c0_i32 = arith.constant 0 : i32
    %c0_i32_0 = arith.constant 0 : i32
    return %arg1, %c0_i32 : i32, i32
  }
  func.func @transform_1(%arg0: i32, %arg1: i32, %arg2: memref<1xi32, #tpu.memory_space<smem>>) -> (i32, i32) {
    %c0_i32 = arith.constant 0 : i32
    %c0_i32_0 = arith.constant 0 : i32
    return %c0_i32, %arg0 : i32, i32
  }
  func.func @transform_2(%arg0: i32, %arg1: i32, %arg2: memref<1xi32, #tpu.memory_space<smem>>) -> (i32, i32) {
    %c0_i32 = arith.constant 0 : i32
    %c0_i32_0 = arith.constant 0 : i32
    return %c0_i32, %arg0 : i32, i32
  }
  func.func @transform_3(%arg0: i32, %arg1: i32, %arg2: memref<1xi32, #tpu.memory_space<smem>>) -> (i32, i32) {
    %c0_i32 = arith.constant 0 : i32
    return %arg1, %arg0 : i32, i32
  }
}

</mosaic_0001>

<bundles_post_ra>
// kernel: tpu_custom_call.1
= control target key start
LH: loop header
LB: loop body
LE: loop exit
PB: predicated region body
PF: predicated region fallthrough
CT: control target
= control target key end

     0   :  { %s699_s0 = inlined_call_operand.<no memory space> [shape: s32[1], index: 0, kind: input, shape index: {}]   ;;  %s700_s1 = inlined_call_operand.hbm [shape: f32[8,8], index: 1, kind: input, shape index: {}]   ;;  %s701_s2 = inlined_call_operand.hbm [shape: f32[8,16], index: 2, kind: input, shape index: {}]   ;;  %s702_s3 = inlined_call_operand.vmem [shape: f32[1,16], index: 3, kind: input, shape index: {}]   ;;  %s703_s4 = inlined_call_operand.hbm [shape: f32[8,16], index: 4, kind: output, shape index: {}]  }
   0x1   :  { %9 = sst [smem:[#allocation3]] %s699_s0 }
   0x2   :  { %10 = vsyncpa [#allocation5], 0 }
   0x3   :  { %11 = vsyncpa [#allocation8], 0 }
   0x4   :  { %12 = vsyncpa [#allocation6], 0  ;;  %s647_s17 = smov [#allocation4]   ;;  %s648_s19 = smov [#allocation7]  }
   0x5   :  { %s19_s18 = sshll.u32 %s647_s17, 4  ;;  %s29_s20 = sshll.u32 %s648_s19, 4  ;;  %s20_s18 = int_to_ptr.vmem [resolvable:$true] %s19_s18  ;;  %s30_s20 = int_to_ptr.vmem [resolvable:$true] %s29_s20 }
   0x6   :  { %s589_s21 = scalar_lea.vmem %s20_s18, 128  ;;  %p594_p1 = scmp.lt.s32.totalorder %s20_s18, %s20_s18 }
   0x7   :  { %p590_p0 = scmp.ne.s32.totalorder %s20_s18, %s589_s21  ;;  %p595_p2 = scmp.lt.s32.totalorder %s589_s21, %s589_s21 }
   0x9   :  { %p596_p3 = por %p595_p2, %p594_p1 }
   0xb   :  { %p597_p4 = pnand %p596_p3, %p590_p0 }
   0xd   :  { %600 = shalt.err (!%p597_p4)
}
   0xe   :  { %22 = dma.hbm_to_vmem [thread:$0]  %s700_s1, 128, %s20_s18, [#allocation5]  }
   0xf   :  { %s609_s0 = scalar_lea.vmem %s30_s20, 128  ;;  %p614_p6 = scmp.lt.s32.totalorder %s30_s20, %s30_s20 }
  0x10   :  { %p610_p5 = scmp.ne.s32.totalorder %s30_s20, %s609_s0  ;;  %p615_p7 = scmp.lt.s32.totalorder %s609_s0, %s609_s0 }
  0x12   :  { %p616_p8 = por %p615_p7, %p614_p6 }
  0x14   :  { %p617_p9 = pnand %p616_p8, %p610_p5 }
  0x16   :  { %620 = shalt.err (!%p617_p9)
}
  0x17   :  { %32 = dma.hbm_to_vmem [thread:$0]  %s701_s2, 128, %s30_s20, [#allocation8]  }
  0x18   :  { %641 = dma.done.wait [#allocation5], 128  }
  0x19   :  { %642 = vsyncadd [#allocation5], 4294967168 }
  0x1a   :  { %643 = dma.done.wait [#allocation8], 128  }
  0x1b   :  { %644 = vsyncadd [#allocation8], 4294967168  ;;  %s41_s26 = sld [smem:[#allocation3]] }
  0x21   :  { %p530_p10 = scmp.eq.s32.totalorder %s41_s26, 0 }
  0x23   :  { %45 = sbr.rel (%p530_p10) target bundleno = 258 (0x102), region = 25 }
  0x28   :  { %v47_v0 = vld [vmem:[#allocation7] sm:$0xff]  ;;  %v46_v1 = vld [vmem:[#allocation4] sm:$0xff]  ;;  %vm55_vm0 = vcmask 64512   ;;  %v649_v2 = vmov 0.0   ;;  %vm650_vm1 = vmmov 0   ;;  %vm505_vm2 = vcmask 130048  }
  0x29   :  { %545 = vmatprep.subr.mxu0 %v649_v2  ;;  %v90_v3 = vand.u32 4294901760, %v47_v0  ;;  %550 = vmatprep.subr.mxu1 %v649_v2  ;;  %v57_v4 = vsel %vm55_vm0, %v46_v1, 0  ;;  %v531_v14 = vld [vmem:[%s702_s3] ss:$0 sm:$0xff] }
  0x2a   :  { %547 = vmatprep.mubr.msk.f32.mxu0 %vm650_vm1, %v649_v2  ;;  %552 = vmatprep.mubr.msk.f32.mxu1 %vm650_vm1, %v649_v2  ;;  %v125_v5 = vand.u32 4294901760, %v57_v4 }
  0x2b   :  { %546 = vmatpush3.msra.mxu0 %v90_v3  ;;  %v167_v6 = vsub.f32 %v47_v0, %v90_v3 }
  0x2c   :  { %555 = vmatprep.subr.mxu0 %v649_v2  ;;  %v126_v7 = vsub.f32 %v57_v4, %v125_v5 }
  0x2d   :  { %v168_v8 = vand.u32 4294901760, %v167_v6 }
  0x2e   :  { %v127_v9 = vand.u32 4294901760, %v126_v7 }
  0x2f   :  { %v169_v10 = vsub.f32 %v167_v6, %v168_v8 }
  0x30   :  { %v128_v11 = vsub.f32 %v126_v7, %v127_v9 }
  0x31   :  { %v170_v12 = vand.u32 4294901760, %v169_v10 }
  0x32   :  { %v129_v13 = vand.u32 4294901760, %v128_v11 }
  0x33   :  { %551 = vmatpush3.msra.mxu1 %v170_v12 }
  0x34   :  { %548 = vmatmul.mubr.f32.vlgmr.msra.gmra.mxu0 %v129_v13  ;;  %553 = vmatmul.mubr.f32.vlgmr.msra.gmra.mxu1 %v125_v5 }
  0x35   :  { %556 = vmatpush3.msra.mxu0 %v167_v6  ;;  %560 = vmatprep.subr.mxu1 %v649_v2 }
  0x36   :  { %561 = vmatpush3.msra.mxu1 %v90_v3  ;;  %557 = vmatprep.mubr.msk.f32.mxu0 %vm650_vm1, %v649_v2 }
  0x37   :  { %562 = vmatprep.mubr.msk.f32.mxu1 %vm650_vm1, %v649_v2  ;;  %565 = vmatprep.subr.mxu0 %v649_v2 }
  0x38   :  { %558 = vmatmul.mubr.f32.vlgmr.msra.gmra.mxu0 %v126_v7  ;;  %563 = vmatmul.mubr.f32.vlgmr.msra.gmra.mxu1 %v127_v9 }
  0x39   :  { %566 = vmatpush3.msra.mxu0 %v168_v8  ;;  %570 = vmatprep.subr.mxu1 %v649_v2 }
  0x3a   :  { %571 = vmatpush3.msra.mxu1 %v90_v3  ;;  %567 = vmatprep.mubr.msk.f32.mxu0 %vm650_vm1, %v649_v2 }
  0x3b   :  { %572 = vmatprep.mubr.msk.f32.mxu1 %vm650_vm1, %v649_v2 }
  0x3c   :  { %568 = vmatmul.mubr.f32.vlgmr.msra.gmra.mxu0 %v125_v5  ;;  %573 = vmatmul.mubr.f32.vlgmr.msra.gmra.mxu1 %v125_v5 }
  0xf4   :  { %v131_v15 = vpop.f32.mrf.mxu0  ;;  %v207_v16 = vpop.f32.mrf.mxu1 }
  0xf5   :  { %v132_v17 = vadd.f32 %v531_v14, %v131_v15 }
  0xf6   :  { %v549_v18 = vpop.f32.mrf.mxu0  ;;  %v554_v19 = vpop.f32.mrf.mxu1 }
  0xf7   :  { %v208_v20 = vadd.f32 %v207_v16, %v132_v17 }
  0xf8   :  { %v281_v21 = vpop.f32.mrf.mxu0  ;;  %v355_v22 = vpop.f32.mrf.mxu1 }
  0xf9   :  { %v282_v23 = vadd.f32 %v281_v21, %v208_v20 }
  0xfa   :  { %v559_v24 = vpop.f32.mrf.mxu0  ;;  %v564_v25 = vpop.f32.mrf.mxu1 }
  0xfb   :  { %v356_v26 = vadd.f32 %v355_v22, %v282_v23 }
  0xfc   :  { %v429_v27 = vpop.f32.mrf.mxu0  ;;  %v501_v28 = vpop.f32.mrf.mxu1 }
  0xfd   :  { %v430_v29 = vadd.f32 %v429_v27, %v356_v26 }
  0xfe   :  { %v569_v30 = vpop.f32.mrf.mxu0  ;;  %v574_v31 = vpop.f32.mrf.mxu1 }
  0xff   :  { %v502_v32 = vadd.f32 %v501_v28, %v430_v29 }
 0x101   :  { %506 = vst.msk [vmem:[#allocation9] sm:$0xff] %vm505_vm2, %v502_v32 }
 0x102 PF:  { %s507_s3 = sld [smem:[#allocation3]] }
 0x108   :  { %p532_p11 = scmp.ne.s32.totalorder %s507_s3, 0 }
 0x10a   :  { %511 = sbr.rel (%p532_p11) target bundleno = 273 (0x111), region = 29 }
 0x10f   :  { %vm512_vm3 = vcmask 130048   ;;  %v651_v33 = vmov 1.0  }
 0x110   :  { %513 = vst.msk [vmem:[#allocation9] sm:$0xff] %vm512_vm3, %v651_v33 }
 0x111 PF:  { %s652_s27 = smov [#allocation9]  }
 0x112   :  { %s520_s28 = sshll.u32 %s652_s27, 4  ;;  %s521_s28 = int_to_ptr.vmem [resolvable:$true] %s520_s28 }
 0x113   :  { %s621_s29 = scalar_lea.vmem %s521_s28, 128  ;;  %p626_p13 = scmp.lt.s32.totalorder %s521_s28, %s521_s28 }
 0x114   :  { %p622_p12 = scmp.ne.s32.totalorder %s521_s28, %s621_s29  ;;  %p627_p0 = scmp.lt.s32.totalorder %s621_s29, %s621_s29 }
 0x116   :  { %p628_p1 = por %p627_p0, %p626_p13 }
 0x118   :  { %p629_p2 = pnand %p628_p1, %p622_p12 }
 0x11a   :  { %632 = shalt.err (!%p629_p2)
}
 0x11b   :  { %523 = dma.vmem_to_hbm [thread:$0]  %s521_s28, 128, %s703_s4, [#allocation6]  }
 0x11c   :  { %645 = dma.done.wait [#allocation6], 128  }
 0x11d   :  { %646 = vsyncadd [#allocation6], 4294967168 }
 0x11e   :  { %527 = vsyncpa [#allocation5], 1 }
 0x11f   :  { %528 = vsyncpa [#allocation8], 1 }
 0x120   :  { %529 = vsyncpa [#allocation6], 1 }

</bundles_post_ra>
